<compile_context>
chip_gen: v5e
topology: v5e:2x2
jax: 0.10.0
libtpu: 0.0.40
codegen_flags: <defaults>
</compile_context>

<pallas_src>
import jax
import jax.numpy as jnp
from jax import lax
from jax.experimental import pallas as pl
from jax.experimental.pallas import tpu as pltpu


def _round_up(v, m):
    return (v + m - 1) // m * m


def _lora_linear_kernel(x_ref, wfc_ref, bias_ref, a_ref, b_ref, o_ref,
                        acc_ref, xa_ref):
    """One (tm, tn) output tile; K reduction over the innermost grid axis."""
    j = pl.program_id(1)
    k = pl.program_id(2)
    nk = pl.num_programs(2)

    @pl.when(k == 0)
    def _():
        acc_ref[...] = jnp.zeros_like(acc_ref)

    @pl.when(jnp.logical_and(j == 0, k == 0))
    def _():
        xa_ref[...] = jnp.zeros_like(xa_ref)

    x = x_ref[...]                                         # (tm, tk)

    # Main projection: contract over K directly against the (tn, tk) slice of
    # W_fc kept in its native (N, K) layout -> no HBM transpose needed.
    acc_ref[...] += lax.dot_general(
        x, wfc_ref[...], dimension_numbers=(((1,), (1,)), ((), ())),
        preferred_element_type=jnp.float32)

    # LoRA down-projection: accumulate x @ A^T across K once per M tile
    # (only while on the first N tile); reused for all other N tiles.
    @pl.when(j == 0)
    def _():
        xa_ref[...] += lax.dot_general(
            x, a_ref[...], dimension_numbers=(((1,), (1,)), ((), ())),
            preferred_element_type=jnp.float32)

    # Epilogue: LoRA up-projection + bias + cast, once per output tile.
    @pl.when(k == nk - 1)
    def _():
        lora_up = lax.dot_general(
            xa_ref[...].astype(b_ref.dtype), b_ref[...],
            dimension_numbers=(((1,), (1,)), ((), ())),
            preferred_element_type=jnp.float32)
        o_ref[...] = (acc_ref[...] + lora_up
                      + bias_ref[...].astype(jnp.float32)).astype(o_ref.dtype)


def lora_linear(x, w_fc, b_fc, w_a, w_b, *, tm=256, tn=512, tk=512):
    """x: (..., K); w_fc: (N, K); b_fc: (N,); w_a: (r, K); w_b: (N, r)."""
    orig_shape = x.shape
    K = orig_shape[-1]
    M = 1
    for d in orig_shape[:-1]:
        M *= d
    N, K_w = w_fc.shape
    assert K_w == K, "w_fc in_features must match x last dim"
    r = w_a.shape[0]
    assert w_a.shape[1] == K and w_b.shape == (N, r)

    x2d = x.reshape(M, K)

    # Clamp tiles to the (padded) problem size; keep (8, 128) layout legality.
    tm = min(tm, _round_up(M, 8))
    tn = min(tn, _round_up(N, 128))
    tk = min(tk, _round_up(K, 128))
    r_pad = _round_up(r, 128)       # lane-dense LoRA rank

    Mp = _round_up(M, tm)
    Np = _round_up(N, tn)
    Kp = _round_up(K, tk)

    def pad2(a, s0, s1):
        p0, p1 = s0 - a.shape[0], s1 - a.shape[1]
        if p0 or p1:
            a = jnp.pad(a, ((0, p0), (0, p1)))
        return a

    # TODO(synk): for production, pre-pad the weights once outside the hot
    # path; these pads are no-ops when shapes are already tile-aligned.
    x_p = pad2(x2d, Mp, Kp)
    wfc_p = pad2(w_fc, Np, Kp)                 # (N, K)   -- no transpose
    a_p = pad2(w_a, r_pad, Kp)                 # (r_pad, K)
    b_p = pad2(w_b, Np, r_pad)                 # (N, r_pad)
    bias_p = pad2(b_fc.reshape(1, N), 1, Np)   # (1, N)

    grid = (Mp // tm, Np // tn, Kp // tk)
    nk = grid[2]

    flops = 2 * Mp * Np * Kp + 2 * Mp * r_pad * Kp + 2 * Mp * Np * r_pad
    bytes_accessed = (x_p.size + wfc_p.size + a_p.size + b_p.size
                      + bias_p.size + Mp * Np) * x.dtype.itemsize

    out = pl.pallas_call(
        _lora_linear_kernel,
        out_shape=jax.ShapeDtypeStruct((Mp, Np), x.dtype),
        grid_spec=pltpu.PrefetchScalarGridSpec(
            num_scalar_prefetch=0,
            grid=grid,
            in_specs=[
                # x tile
                pl.BlockSpec((tm, tk), lambda i, j, k: (i, k)),
                # W_fc tile, native (N, K) layout
                pl.BlockSpec((tn, tk), lambda i, j, k: (j, k)),
                # bias: indexed by j only (fetched once per N tile)
                pl.BlockSpec((1, tn), lambda i, j, k: (0, j)),
                # LoRA A: only consumed while j == 0; freeze the block index
                # afterwards so no redundant DMAs are issued for j > 0.
                pl.BlockSpec((r_pad, tk),
                             lambda i, j, k: (0, jnp.where(j == 0, k, nk - 1))),
                # LoRA B tile (small, constant over k)
                pl.BlockSpec((tn, r_pad), lambda i, j, k: (j, 0)),
            ],
            out_specs=pl.BlockSpec((tm, tn), lambda i, j, k: (i, j)),
            scratch_shapes=[
                pltpu.VMEM((tm, tn), jnp.float32),     # main accumulator
                pltpu.VMEM((tm, r_pad), jnp.float32),  # x @ A^T accumulator
            ]),
        compiler_params=pltpu.CompilerParams(
            # i parallel (megacore split); j arbitrary so the LoRA
            # down-projection scratch can be reused across N tiles;
            # k innermost reduction.
            dimension_semantics=("parallel", "arbitrary", "arbitrary")),
        cost_estimate=pl.CostEstimate(flops=flops, transcendentals=0,
                                      bytes_accessed=bytes_accessed),
    )(x_p, wfc_p, bias_p, a_p, b_p)

    out = out[:M, :N]
    return out.reshape(*orig_shape[:-1], N)


def init_params(key, in_features, out_features, ab_r, dtype=jnp.float32):
    """Deterministic parameter init mirroring the PyTorch module's __init__."""
    k_w, k_b, k_a = jax.random.split(key, 3)

    bound_fc = 1.0 / (in_features ** 0.5)
    w_fc = jax.random.uniform(k_w, (out_features, in_features), dtype,
                              minval=-bound_fc, maxval=bound_fc)
    b_fc = jax.random.uniform(k_b, (out_features,), dtype,
                              minval=-bound_fc, maxval=bound_fc)

    n = max(1, out_features // ab_r)
    bound_a = (3.0 / in_features) ** 0.5
    w_a = jax.random.uniform(k_a, (n, in_features), dtype,
                             minval=-bound_a, maxval=bound_a)
    w_b = jnp.zeros((out_features, n), dtype)   # LoRA B: zeros (PyTorch init)
    return w_fc, b_fc, w_a, w_b


if __name__ == "__main__":
    key = jax.random.PRNGKey(0)
    k_x, k_p, k_b2 = jax.random.split(key, 3)

    # --- Test 1: module-consistent small shapes ---
    batch, seq, hidden = 2, 8, 32
    out_features, ab_r = 32, 4

    x = jax.random.normal(k_x, (batch, seq, hidden), jnp.float32)
    w_fc, b_fc, w_a, w_b = init_params(k_p, hidden, out_features, ab_r)
    # PyTorch zero-inits LoRA B; use small random values here so the LoRA
    # path is actually exercised numerically.
    w_b = 0.1 * jax.random.normal(k_b2, w_b.shape, jnp.float32)

    y = jax.block_until_ready(lora_linear(x, w_fc, b_fc, w_a, w_b))
    y_ref = x @ w_fc.T + b_fc + (x @ w_a.T) @ w_b.T
    assert y.shape == (batch, seq, out_features)
    assert jnp.allclose(y, y_ref, atol=1e-5, rtol=1e-5)

    # --- Test 2: tiny tiles to exercise the multi-block (2,2,2) grid,
    #     K-accumulation and LoRA-scratch reuse across N tiles ---
    b2, s2, h2, o2 = 2, 16, 256, 256
    r2 = o2 // ab_r
    kk = jax.random.split(k_p, 5)
    x2 = jax.random.normal(kk[0], (b2, s2, h2), jnp.float32)
    w_fc2 = 0.05 * jax.random.normal(kk[1], (o2, h2), jnp.float32)
    b_fc2 = 0.05 * jax.random.normal(kk[2], (o2,), jnp.float32)
    w_a2 = 0.05 * jax.random.normal(kk[3], (r2, h2), jnp.float32)
    w_b2 = 0.05 * jax.random.normal(kk[4], (o2, r2), jnp.float32)

    y2 = jax.block_until_ready(
        lora_linear(x2, w_fc2, b_fc2, w_a2, w_b2, tm=16, tn=128, tk=128))
    y2_ref = x2 @ w_fc2.T + b_fc2 + (x2 @ w_a2.T) @ w_b2.T
    assert jnp.allclose(y2, y2_ref, atol=1e-4, rtol=1e-4)

    print("KERNEL_OK")
</pallas_src>

<mosaic_0001>
module attributes {stable_mosaic.version = 11 : i64} {
  func.func @_lora_linear_kernel(%arg0: i32, %arg1: i32, %arg2: i32, %arg3: memref<16x128xf32, #tpu.memory_space<vmem>>, %arg4: memref<128x128xf32, #tpu.memory_space<vmem>>, %arg5: memref<1x128xf32, #tpu.memory_space<vmem>>, %arg6: memref<128x128xf32, #tpu.memory_space<vmem>>, %arg7: memref<128x128xf32, #tpu.memory_space<vmem>>, %arg8: memref<16x128xf32, #tpu.memory_space<vmem>>, %arg9: memref<16x128xf32, #tpu.memory_space<vmem>>, %arg10: memref<16x128xf32, #tpu.memory_space<vmem>>) attributes {dimension_semantics = [#tpu.dimension_semantics<parallel>, #tpu.dimension_semantics<arbitrary>, #tpu.dimension_semantics<arbitrary>], iteration_bounds = array<i64: 1, 1, 1>, scalar_prefetch = 0 : i64, scratch_operands = 2 : i64, tpu.core_type = #tpu.core_type<tc>, window_params = [{transform_indices = @transform_0, window_bounds = array<i64: 16, 128>}, {transform_indices = @transform_1, window_bounds = array<i64: 128, 128>}, {transform_indices = @transform_2, window_bounds = array<i64: 1, 128>}, {transform_indices = @transform_3, window_bounds = array<i64: 128, 128>}, {transform_indices = @transform_4, window_bounds = array<i64: 128, 128>}, {transform_indices = @transform_5, window_bounds = array<i64: 16, 128>}]} {
    %c0_i32 = arith.constant 0 : i32
    %0 = arith.cmpi eq, %arg2, %c0_i32 : i32
    %1 = arith.extui %0 : i1 to i32
    %c0_i32_0 = arith.constant 0 : i32
    %2 = arith.cmpi ne, %1, %c0_i32_0 : i32
    scf.if %2 {
      %cst_15 = arith.constant 0.000000e+00 : f32
      %20 = vector.broadcast %cst_15 : f32 to vector<16x128xf32>
      %c0_16 = arith.constant 0 : index
      %c0_17 = arith.constant 0 : index
      %21 = vector.load %arg9[%c0_16, %c0_17] : memref<16x128xf32, #tpu.memory_space<vmem>>, vector<16x128xf32>
      tpu.vector_store %arg9[%c0_16, %c0_17], %20 {strides = array<i32>} : memref<16x128xf32, #tpu.memory_space<vmem>>, vector<16x128xf32>,
    } else {
    }
    %c0_i32_1 = arith.constant 0 : i32
    %3 = arith.cmpi eq, %arg1, %c0_i32_1 : i32
    %c0_i32_2 = arith.constant 0 : i32
    %4 = arith.cmpi eq, %arg2, %c0_i32_2 : i32
    %5 = arith.andi %3, %4 : i1
    %6 = arith.extui %5 : i1 to i32
    %c0_i32_3 = arith.constant 0 : i32
    %7 = arith.cmpi ne, %6, %c0_i32_3 : i32
    scf.if %7 {
      %cst_15 = arith.constant 0.000000e+00 : f32
      %20 = vector.broadcast %cst_15 : f32 to vector<16x128xf32>
      %c0_16 = arith.constant 0 : index
      %c0_17 = arith.constant 0 : index
      %21 = vector.load %arg10[%c0_16, %c0_17] : memref<16x128xf32, #tpu.memory_space<vmem>>, vector<16x128xf32>
      tpu.vector_store %arg10[%c0_16, %c0_17], %20 {strides = array<i32>} : memref<16x128xf32, #tpu.memory_space<vmem>>, vector<16x128xf32>,
    } else {
    }
    %c0 = arith.constant 0 : index
    %c0_4 = arith.constant 0 : index
    %8 = vector.load %arg3[%c0, %c0_4] : memref<16x128xf32, #tpu.memory_space<vmem>>, vector<16x128xf32>
    %c0_5 = arith.constant 0 : index
    %c0_6 = arith.constant 0 : index
    %9 = vector.load %arg9[%c0_5, %c0_6] : memref<16x128xf32, #tpu.memory_space<vmem>>, vector<16x128xf32>
    %c0_7 = arith.constant 0 : index
    %c0_8 = arith.constant 0 : index
    %10 = vector.load %arg4[%c0_7, %c0_8] : memref<128x128xf32, #tpu.memory_space<vmem>>, vector<128x128xf32>
    %cst = arith.constant dense<0.000000e+00> : vector<16x128xf32>
    %11 = tpu.matmul %8, %10, %cst {dimension_numbers = #tpu.dot_dimension_numbers<[1], [1], [0], [0], [0, 0, 1, 0], [], []>} : vector<16x128xf32>, vector<128x128xf32>, vector<16x128xf32> -> vector<16x128xf32>
    %12 = arith.addf %9, %11 : vector<16x128xf32>
    %c0_9 = arith.constant 0 : index
    %c0_10 = arith.constant 0 : index
    %13 = vector.load %arg9[%c0_9, %c0_10] : memref<16x128xf32, #tpu.memory_space<vmem>>, vector<16x128xf32>
    tpu.vector_store %arg9[%c0_9, %c0_10], %12 {strides = array<i32>} : memref<16x128xf32, #tpu.memory_space<vmem>>, vector<16x128xf32>,
    %c0_i32_11 = arith.constant 0 : i32
    %14 = arith.cmpi eq, %arg1, %c0_i32_11 : i32
    %15 = arith.extui %14 : i1 to i32
    %c0_i32_12 = arith.constant 0 : i32
    %16 = arith.cmpi ne, %15, %c0_i32_12 : i32
    scf.if %16 {
      %c0_15 = arith.constant 0 : index
      %c0_16 = arith.constant 0 : index
      %20 = vector.load %arg10[%c0_15, %c0_16] : memref<16x128xf32, #tpu.memory_space<vmem>>, vector<16x128xf32>
      %c0_17 = arith.constant 0 : index
      %c0_18 = arith.constant 0 : index
      %21 = vector.load %arg6[%c0_17, %c0_18] : memref<128x128xf32, #tpu.memory_space<vmem>>, vector<128x128xf32>
      %cst_19 = arith.constant dense<0.000000e+00> : vector<16x128xf32>
      %22 = tpu.matmul %8, %21, %cst_19 {dimension_numbers = #tpu.dot_dimension_numbers<[1], [1], [0], [0], [0, 0, 1, 0], [], []>} : vector<16x128xf32>, vector<128x128xf32>, vector<16x128xf32> -> vector<16x128xf32>
      %23 = arith.addf %20, %22 : vector<16x128xf32>
      %c0_20 = arith.constant 0 : index
      %c0_21 = arith.constant 0 : index
      %24 = vector.load %arg10[%c0_20, %c0_21] : memref<16x128xf32, #tpu.memory_space<vmem>>, vector<16x128xf32>
      tpu.vector_store %arg10[%c0_20, %c0_21], %23 {strides = array<i32>} : memref<16x128xf32, #tpu.memory_space<vmem>>, vector<16x128xf32>,
    } else {
    }
    %c0_i32_13 = arith.constant 0 : i32
    %17 = arith.cmpi eq, %arg2, %c0_i32_13 : i32
    %18 = arith.extui %17 : i1 to i32
    %c0_i32_14 = arith.constant 0 : i32
    %19 = arith.cmpi ne, %18, %c0_i32_14 : i32
    scf.if %19 {
      %c0_15 = arith.constant 0 : index
      %c0_16 = arith.constant 0 : index
      %20 = vector.load %arg10[%c0_15, %c0_16] : memref<16x128xf32, #tpu.memory_space<vmem>>, vector<16x128xf32>
      %c0_17 = arith.constant 0 : index
      %c0_18 = arith.constant 0 : index
      %21 = vector.load %arg7[%c0_17, %c0_18] : memref<128x128xf32, #tpu.memory_space<vmem>>, vector<128x128xf32>
      %cst_19 = arith.constant dense<0.000000e+00> : vector<16x128xf32>
      %22 = tpu.matmul %20, %21, %cst_19 {dimension_numbers = #tpu.dot_dimension_numbers<[1], [1], [0], [0], [0, 0, 1, 0], [], []>} : vector<16x128xf32>, vector<128x128xf32>, vector<16x128xf32> -> vector<16x128xf32>
      %c0_20 = arith.constant 0 : index
      %c0_21 = arith.constant 0 : index
      %23 = vector.load %arg9[%c0_20, %c0_21] : memref<16x128xf32, #tpu.memory_space<vmem>>, vector<16x128xf32>
      %24 = arith.addf %23, %22 : vector<16x128xf32>
      %c0_22 = arith.constant 0 : index
      %c0_23 = arith.constant 0 : index
      %25 = vector.load %arg5[%c0_22, %c0_23] : memref<1x128xf32, #tpu.memory_space<vmem>>, vector<1x128xf32>
      %26 = vector.broadcast %25 : vector<1x128xf32> to vector<16x128xf32>
      %27 = arith.addf %24, %26 : vector<16x128xf32>
      %c0_24 = arith.constant 0 : index
      %c0_25 = arith.constant 0 : index
      %28 = vector.load %arg8[%c0_24, %c0_25] : memref<16x128xf32, #tpu.memory_space<vmem>>, vector<16x128xf32>
      tpu.vector_store %arg8[%c0_24, %c0_25], %27 {strides = array<i32>} : memref<16x128xf32, #tpu.memory_space<vmem>>, vector<16x128xf32>,
    } else {
    }
    return
  }
  func.func @transform_0(%arg0: i32, %arg1: i32, %arg2: i32) -> (i32, i32) {
    %c0_i32 = arith.constant 0 : i32
    return %arg0, %arg2 : i32, i32
  }
  func.func @transform_1(%arg0: i32, %arg1: i32, %arg2: i32) -> (i32, i32) {
    %c0_i32 = arith.constant 0 : i32
    return %arg1, %arg2 : i32, i32
  }
  func.func @transform_2(%arg0: i32, %arg1: i32, %arg2: i32) -> (i32, i32) {
    %c0_i32 = arith.constant 0 : i32
    %c0_i32_0 = arith.constant 0 : i32
    return %c0_i32, %arg1 : i32, i32
  }
  func.func @transform_3(%arg0: i32, %arg1: i32, %arg2: i32) -> (i32, i32) {
    %c0_i32 = arith.constant 0 : i32
    %0 = arith.cmpi eq, %arg1, %c0_i32 : i32
    %c0_i32_0 = arith.constant 0 : i32
    %1 = arith.select %0, %arg2, %c0_i32_0 : i32
    %c0_i32_1 = arith.constant 0 : i32
    %c0_i32_2 = arith.constant 0 : i32
    return %c0_i32_1, %1 : i32, i32
  }
  func.func @transform_4(%arg0: i32, %arg1: i32, %arg2: i32) -> (i32, i32) {
    %c0_i32 = arith.constant 0 : i32
    %c0_i32_0 = arith.constant 0 : i32
    return %arg1, %c0_i32 : i32, i32
  }
  func.func @transform_5(%arg0: i32, %arg1: i32, %arg2: i32) -> (i32, i32) {
    %c0_i32 = arith.constant 0 : i32
    return %arg0, %arg1 : i32, i32
  }
}

</mosaic_0001>

<bundles_post_ra>
// kernel: tpu_custom_call.1
= control target key start
LH: loop header
LB: loop body
LE: loop exit
PB: predicated region body
PF: predicated region fallthrough
CT: control target
= control target key end

     0   :  { %10 = vsyncpa [#allocation5], 0  ;;  %s499_s0 = inlined_call_operand.hbm [shape: f32[16,128], index: 0, kind: input, shape index: {}]   ;;  %s500_s1 = inlined_call_operand.hbm [shape: f32[128,128], index: 1, kind: input, shape index: {}]   ;;  %s501_s2 = inlined_call_operand.vmem [shape: f32[1,128], index: 2, kind: input, shape index: {}]   ;;  %s502_s3 = inlined_call_operand.hbm [shape: f32[128,128], index: 3, kind: input, shape index: {}]   ;;  %s503_s4 = inlined_call_operand.hbm [shape: f32[128,128], index: 4, kind: input, shape index: {}]   ;;  %s504_s5 = inlined_call_operand.hbm [shape: f32[16,128], index: 5, kind: output, shape index: {}]  }
   0x1   :  { %11 = vsyncpa [#allocation8], 0 }
   0x2   :  { %12 = vsyncpa [#allocation11], 0 }
   0x3   :  { %13 = vsyncpa [#allocation6], 0  ;;  %s31_s20 = sshll.u32 %s500_s1, 4  ;;  %s429_s21 = smov [#allocation7]   ;;  %s32_s20 = int_to_ptr.hbm [resolvable:$true] %s31_s20 }
   0x4   :  { %s33_s22 = sshll.u32 %s429_s21, 4  ;;  %s18_s25 = sshll.u32 %s499_s0, 4  ;;  %s34_s22 = int_to_ptr.vmem [resolvable:$true] %s33_s22  ;;  %s19_s25 = int_to_ptr.hbm [resolvable:$true] %s18_s25 }
   0x5   :  { %s430_s26 = smov 128   ;;  %s431_s27 = smov 8  }
   0x6   :  { %39 = dma.hbm_to_vmem [thread:$0]  %s32_s20, 2048, %s34_s22, [#allocation8], %s430_s26, %s430_s26, %s431_s27  }
   0x7   :  { %s432_s28 = smov [#allocation4]   ;;  %s50_s1 = sshll.u32 %s502_s3, 4  ;;  %s51_s1 = int_to_ptr.hbm [resolvable:$true] %s50_s1 }
   0x8   :  { %s20_s29 = sshll.u32 %s432_s28, 4  ;;  %s63_s8 = sshll.u32 %s503_s4, 4  ;;  %s21_s29 = int_to_ptr.vmem [resolvable:$true] %s20_s29  ;;  %s64_s8 = int_to_ptr.hbm [resolvable:$true] %s63_s8 }
   0x9   :  { %26 = dma.hbm_to_vmem [thread:$0]  %s19_s25, 256, %s21_s29, [#allocation5], %s430_s26, %s430_s26, %s431_s27  }
   0xa   :  { %s433_s9 = smov [#allocation9]   ;;  %s434_s11 = smov [#allocation10]  }
   0xb   :  { %s52_s10 = sshll.u32 %s433_s9, 4  ;;  %s65_s3 = sshll.u32 %s434_s11, 4  ;;  %s53_s10 = int_to_ptr.vmem [resolvable:$true] %s52_s10  ;;  %s66_s3 = int_to_ptr.vmem [resolvable:$true] %s65_s3 }
   0xc   :  { %58 = dma.hbm_to_vmem [thread:$0]  %s51_s1, 2048, %s53_s10, [#allocation8], %s430_s26, %s430_s26, %s431_s27  }
   0xd   :  { %71 = dma.hbm_to_vmem [thread:$0]  %s64_s8, 2048, %s66_s3, [#allocation11], %s430_s26, %s430_s26, %s431_s27  }
   0xe   :  { %421 = dma.done.wait [#allocation5], 256  }
   0xf   :  { %422 = vsyncadd [#allocation5], 4294967040 }
  0x10   :  { %423 = dma.done.wait [#allocation8], 4096  }
  0x11   :  { %424 = vsyncadd [#allocation8], 4294963200 }
  0x12   :  { %425 = dma.done.wait [#allocation11], 2048  }
  0x13   :  { %426 = vsyncadd [#allocation11], 4294965248  ;;  %v170_v0 = vld [vmem:[#allocation9 + $0x78] sm:$0xff]  ;;  %v169_v1 = vld [vmem:[#allocation9 + $0x70] sm:$0xff]  ;;  %s435_s13 = smov [#allocation12]   ;;  %s260_s17 = sshll.u32 %s504_s5, 4  ;;  %s261_s17 = int_to_ptr.hbm [resolvable:$true] %s260_s17 }
  0x14   :  { %171 = vmatpush.xpose.msra.mxu1 %v170_v0  ;;  %v168_v2 = vld [vmem:[#allocation9 + $0x68] sm:$0xff]  ;;  %v167_v3 = vld [vmem:[#allocation9 + $0x60] sm:$0xff]  ;;  %v166_v4 = vld [vmem:[#allocation9 + $0x58] sm:$0xff]  ;;  %s258_s14 = sshll.u32 %s435_s13, 4  ;;  %s259_s14 = int_to_ptr.vmem [resolvable:$true] %s258_s14 }
  0x15   :  { %v165_v5 = vld [vmem:[#allocation9 + $0x50] sm:$0xff]  ;;  %v164_v6 = vld [vmem:[#allocation9 + $0x48] sm:$0xff]  ;;  %v163_v7 = vld [vmem:[#allocation9 + $0x40] sm:$0xff] }
  0x16   :  { %v162_v8 = vld [vmem:[#allocation9 + $0x38] sm:$0xff]  ;;  %v161_v9 = vld [vmem:[#allocation9 + $0x30] sm:$0xff]  ;;  %v160_v10 = vld [vmem:[#allocation9 + $0x28] sm:$0xff] }
  0x17   :  { %v218_v11 = vld [vmem:[#allocation10 + $0x78] sm:$0xff]  ;;  %v159_v13 = vld [vmem:[#allocation9 + $0x20] sm:$0xff]  ;;  %v217_v14 = vld [vmem:[#allocation10 + $0x70] sm:$0xff] }
  0x18   :  { %172 = vmatpush.xpose.msra.mxu1 %v169_v1  ;;  %v122_v12 = vld [vmem:[#allocation7 + $0x78] sm:$0xff]  ;;  %219 = vmatpush.xpose.msra.mxu2 %v218_v11  ;;  %v121_v15 = vld [vmem:[#allocation7 + $0x70] sm:$0xff]  ;;  %v216_v17 = vld [vmem:[#allocation10 + $0x68] sm:$0xff] }
  0x19   :  { %123 = vmatpush.xpose.msra.mxu0 %v122_v12  ;;  %277 = vmatpush.xpose.msra.mxu3 %v122_v12  ;;  %v158_v16 = vld [vmem:[#allocation9 + $0x18] sm:$0xff]  ;;  %v120_v18 = vld [vmem:[#allocation7 + $0x68] sm:$0xff]  ;;  %v157_v19 = vld [vmem:[#allocation9 + $0x10] sm:$0xff] }
  0x1a   :  { %v215_v20 = vld [vmem:[#allocation10 + $0x60] sm:$0xff]  ;;  %v156_v22 = vld [vmem:[#allocation9 + $0x8] sm:$0xff]  ;;  %v214_v23 = vld [vmem:[#allocation10 + $0x58] sm:$0xff] }
  0x1b   :  { %v119_v21 = vld [vmem:[#allocation7 + $0x60] sm:$0xff]  ;;  %v118_v24 = vld [vmem:[#allocation7 + $0x58] sm:$0xff]  ;;  %v213_v26 = vld [vmem:[#allocation10 + $0x50] sm:$0xff] }
  0x1c   :  { %173 = vmatpush.xpose.msra.mxu1 %v168_v2  ;;  %220 = vmatpush.xpose.msra.mxu2 %v217_v14  ;;  %v155_v25 = vld [vmem:[#allocation9] sm:$0xff]  ;;  %v117_v27 = vld [vmem:[#allocation7 + $0x50] sm:$0xff]  ;;  %v212_v29 = vld [vmem:[#allocation10 + $0x48] sm:$0xff] }
  0x1d   :  { %124 = vmatpush.xpose.msra.mxu0 %v121_v15  ;;  %278 = vmatpush.xpose.msra.mxu3 %v121_v15  ;;  %v103_v28 = vld [vmem:[#allocation4] sm:$0xff]  ;;  %v116_v30 = vld [vmem:[#allocation7 + $0x48] sm:$0xff]  ;;  %v211_v31 = vld [vmem:[#allocation10 + $0x40] sm:$0xff] }
  0x1e   :  { %v115_v32 = vld [vmem:[#allocation7 + $0x40] sm:$0xff]  ;;  %v104_v33 = vld [vmem:[#allocation4 + $0x8] sm:$0xff]  ;;  %v209_v36 = vld [vmem:[#allocation10 + $0x30] sm:$0xff] }
  0x1f   :  { %v210_v34 = vld [vmem:[#allocation10 + $0x38] sm:$0xff]  ;;  %v113_v37 = vld [vmem:[#allocation7 + $0x30] sm:$0xff]  ;;  %v208_v38 = vld [vmem:[#allocation10 + $0x28] sm:$0xff] }
  0x20   :  { %174 = vmatpush.xpose.msra.mxu1 %v167_v3  ;;  %221 = vmatpush.xpose.msra.mxu2 %v216_v17  ;;  %v114_v35 = vld [vmem:[#allocation7 + $0x38] sm:$0xff]  ;;  %v112_v39 = vld [vmem:[#allocation7 + $0x28] sm:$0xff]  ;;  %v207_v40 = vld [vmem:[#allocation10 + $0x20] sm:$0xff] }
  0x21   :  { %125 = vmatpush.xpose.msra.mxu0 %v120_v18  ;;  %279 = vmatpush.xpose.msra.mxu3 %v120_v18  ;;  %v111_v41 = vld [vmem:[#allocation7 + $0x20] sm:$0xff]  ;;  %v206_v42 = vld [vmem:[#allocation10 + $0x18] sm:$0xff]  ;;  %v205_v44 = vld [vmem:[#allocation10 + $0x10] sm:$0xff] }
  0x22   :  { %v110_v43 = vld [vmem:[#allocation7 + $0x18] sm:$0xff]  ;;  %v109_v45 = vld [vmem:[#allocation7 + $0x10] sm:$0xff]  ;;  %v204_v46 = vld [vmem:[#allocation10 + $0x8] sm:$0xff] }
  0x23   :  { %v108_v47 = vld [vmem:[#allocation7 + $0x8] sm:$0xff]  ;;  %v203_v48 = vld [vmem:[#allocation10] sm:$0xff]  ;;  %v300_v53 = vld [vmem:[%s501_s2] ss:$0 sm:$0xff] }
  0x24   :  { %175 = vmatpush.xpose.msra.mxu1 %v166_v4  ;;  %222 = vmatpush.xpose.msra.mxu2 %v215_v20  ;;  %v107_v49 = vld [vmem:[#allocation7] sm:$0xff] }
  0x25   :  { %126 = vmatpush.xpose.msra.mxu0 %v119_v21  ;;  %280 = vmatpush.xpose.msra.mxu3 %v119_v21 }
  0x28   :  { %176 = vmatpush.xpose.msra.mxu1 %v165_v5  ;;  %223 = vmatpush.xpose.msra.mxu2 %v214_v23 }
  0x29   :  { %127 = vmatpush.xpose.msra.mxu0 %v118_v24  ;;  %281 = vmatpush.xpose.msra.mxu3 %v118_v24 }
  0x2c   :  { %177 = vmatpush.xpose.msra.mxu1 %v164_v6  ;;  %224 = vmatpush.xpose.msra.mxu2 %v213_v26 }
  0x2d   :  { %128 = vmatpush.xpose.msra.mxu0 %v117_v27  ;;  %282 = vmatpush.xpose.msra.mxu3 %v117_v27 }
  0x30   :  { %178 = vmatpush.xpose.msra.mxu1 %v163_v7  ;;  %225 = vmatpush.xpose.msra.mxu2 %v212_v29 }
  0x31   :  { %129 = vmatpush.xpose.msra.mxu0 %v116_v30  ;;  %283 = vmatpush.xpose.msra.mxu3 %v116_v30 }
  0x34   :  { %179 = vmatpush.xpose.msra.mxu1 %v162_v8  ;;  %226 = vmatpush.xpose.msra.mxu2 %v211_v31 }
  0x35   :  { %130 = vmatpush.xpose.msra.mxu0 %v115_v32  ;;  %284 = vmatpush.xpose.msra.mxu3 %v115_v32 }
  0x38   :  { %180 = vmatpush.xpose.msra.mxu1 %v161_v9  ;;  %227 = vmatpush.xpose.msra.mxu2 %v210_v34 }
  0x39   :  { %131 = vmatpush.xpose.msra.mxu0 %v114_v35  ;;  %285 = vmatpush.xpose.msra.mxu3 %v114_v35 }
  0x3c   :  { %181 = vmatpush.xpose.msra.mxu1 %v160_v10  ;;  %228 = vmatpush.xpose.msra.mxu2 %v209_v36 }
  0x3d   :  { %132 = vmatpush.xpose.msra.mxu0 %v113_v37  ;;  %286 = vmatpush.xpose.msra.mxu3 %v113_v37 }
  0x40   :  { %182 = vmatpush.xpose.msra.mxu1 %v159_v13  ;;  %229 = vmatpush.xpose.msra.mxu2 %v208_v38 }
  0x41   :  { %133 = vmatpush.xpose.msra.mxu0 %v112_v39  ;;  %287 = vmatpush.xpose.msra.mxu3 %v112_v39 }
  0x44   :  { %183 = vmatpush.xpose.msra.mxu1 %v158_v16  ;;  %230 = vmatpush.xpose.msra.mxu2 %v207_v40 }
  0x45   :  { %134 = vmatpush.xpose.msra.mxu0 %v111_v41  ;;  %288 = vmatpush.xpose.msra.mxu3 %v111_v41 }
  0x48   :  { %184 = vmatpush.xpose.msra.mxu1 %v157_v19  ;;  %231 = vmatpush.xpose.msra.mxu2 %v206_v42 }
  0x49   :  { %135 = vmatpush.xpose.msra.mxu0 %v110_v43  ;;  %289 = vmatpush.xpose.msra.mxu3 %v110_v43 }
  0x4c   :  { %185 = vmatpush.xpose.msra.mxu1 %v156_v22  ;;  %232 = vmatpush.xpose.msra.mxu2 %v205_v44 }
  0x4d   :  { %136 = vmatpush.xpose.msra.mxu0 %v109_v45  ;;  %290 = vmatpush.xpose.msra.mxu3 %v109_v45 }
  0x50   :  { %186 = vmatpush.xpose.msra.mxu1 %v155_v25  ;;  %233 = vmatpush.xpose.msra.mxu2 %v204_v46 }
  0x51   :  { %137 = vmatpush.xpose.msra.mxu0 %v108_v47  ;;  %291 = vmatpush.xpose.msra.mxu3 %v108_v47 }
  0x53   :  { %187 = vmatmul.f32.vlgmr.msra.gmra.mxu1 %v103_v28 }
  0x54   :  { %234 = vmatpush.xpose.msra.mxu2 %v203_v48 }
  0x55   :  { %138 = vmatpush.xpose.msra.mxu0 %v107_v49  ;;  %292 = vmatpush.xpose.msra.mxu3 %v107_v49 }
  0x58   :  { %139 = vmatmul.f32.vlgmr.msra.gmra.mxu0 %v103_v28  ;;  %142 = vmatmul.f32.vlgmr.msra.gmra.mxu3 %v104_v33 }
  0x5b   :  { %190 = vmatmul.f32.gmra.mxu1 %v104_v33 }
  0xd0   :  { %v188_v50 = vpop.f32.mrf.mxu1 }
  0xd1   :  { %235 = vmatmul.f32.vlgmr.msra.gmra.mxu2 %v188_v50 }
  0xd5   :  { %v140_v52 = vpop.f32.mrf.mxu0 }
  0xd8   :  { %v191_v51 = vpop.f32.mrf.mxu1 }
  0xd9   :  { %238 = vmatmul.f32.gmra.mxu2 %v191_v51 }
  0xdb   :  { %v143_v57 = vpop.f32.mrf.mxu3 }
 0x154   :  { %v236_v54 = vpop.f32.mrf.mxu2 }
 0x155   :  { %v244_v55 = vadd.f32 %v236_v54, %v140_v52 }
 0x157   :  { %v250_v56 = vadd.f32 %v300_v53, %v244_v55 }
 0x159   :  { %252 = vst [vmem:[#allocation12] sm:$0xff] %v250_v56 }
 0x15c   :  { %v239_v58 = vpop.f32.mrf.mxu2 }
 0x15d   :  { %v245_v59 = vadd.f32 %v239_v58, %v143_v57 }
 0x15f   :  { %v251_v60 = vadd.f32 %v300_v53, %v245_v59 }
 0x161   :  { %253 = vst [vmem:[#allocation12 + $0x8] sm:$0xff] %v251_v60 }
 0x162   :  { %266 = dma.vmem_to_hbm [thread:$0]  %s259_s14, 256, %s261_s17, [#allocation6], %s430_s26, %s430_s26, %s431_s27  }
 0x163   :  { %427 = dma.done.wait [#allocation6], 256  }
 0x164   :  { %428 = vsyncadd [#allocation6], 4294967040 }
 0x165   :  { %271 = vsyncpa [#allocation5], 1 }
 0x166   :  { %272 = vsyncpa [#allocation8], 1 }
 0x167   :  { %273 = vsyncpa [#allocation11], 1 }
 0x168   :  { %274 = vsyncpa [#allocation6], 1 }

</bundles_post_ra>
